<compile_context>
chip_gen: v7x
topology: tpu7x:2x2x1
jax: 0.10.0
libtpu: 0.0.40
codegen_flags: <defaults>
</compile_context>

<pallas_src>
import jax
import jax.numpy as jnp
from jax.experimental import pallas as pl
from jax.experimental.pallas import tpu as pltpu


def _attention_kernel(h_ref, w1t_ref, b1_ref, w2_ref, b2_ref,
                      attended_ref, weights_ref):
    """One grid step == one block of Bb batch elements.

    h_ref        : (Bb, S, H)  hidden-state tile (input dtype)
    w1t_ref      : (H, H)      first Linear weight, pre-transposed (in x out)
    b1_ref       : (1, H)      first Linear bias
    w2_ref       : (1, H)      second Linear weight (out=1, in=H)
    b2_ref       : (1,) SMEM   second Linear bias (scalar)
    attended_ref : (Bb, H)     weighted-sum output (lane-dense)
    weights_ref  : (Bb, S)     softmax attention weights (lane-dense, S on lanes)
    """
    Bb, S, H = h_ref.shape
    h = h_ref[...]                                              # (Bb, S, H)

    # ---- Linear1 + tanh: one MXU matmul over the whole tile ------------------
    # The 2-D reshape is layout-free only when S is a multiple of the sublane
    # pack (8 f32 / 16 bf16 / 32 int8); otherwise contract over H directly on
    # the 3-D tile so Mosaic does not insert a hidden VMEM relayout copy.
    sublane_pack = 32 // jnp.dtype(h_ref.dtype).itemsize
    if S % sublane_pack == 0:
        z = jnp.dot(h.reshape(Bb * S, H), w1t_ref[...],
                    preferred_element_type=jnp.float32).reshape(Bb, S, H)
    else:
        z = jax.lax.dot_general(h, w1t_ref[...],
                                dimension_numbers=(((2,), (0,)), ((), ())),
                                preferred_element_type=jnp.float32)
    z = jnp.tanh(z + b1_ref[...].astype(jnp.float32))           # (Bb, S, H) f32

    # ---- Linear2 (out_features=1): VPU multiply + lane reduce (no MXU) -------
    scores = jnp.sum(z * w2_ref[...].astype(jnp.float32), axis=-1) + b2_ref[0]

    # ---- softmax over the sequence axis (lane axis) ---------------------------
    m = jnp.max(scores, axis=-1, keepdims=True)                 # (Bb, 1)
    e = jnp.exp(scores - m)                                     # (Bb, S)
    denom = jnp.sum(e, axis=-1, keepdims=True)                  # (Bb, 1)
    attn = e * pl.reciprocal(denom, approx=False)               # (Bb, S) f32

    # ---- weighted sum over S: VPU multiply + cross-sublane reduce -------------
    # (replaces Bb tiny (1,S)x(S,H) MXU matmuls that each used 1/8 of the MXU)
    attended = jnp.sum(attn[:, :, None] * h.astype(jnp.float32), axis=1)  # (Bb, H)

    weights_ref[...] = attn.astype(weights_ref.dtype)
    attended_ref[...] = attended.astype(attended_ref.dtype)


def _round_up(x, m):
    return ((x + m - 1) // m) * m


def _per_batch_vmem_bytes(S, H, itemsize):
    """VMEM bytes one batch row keeps live through the pipeline."""
    return (2 * S * H * itemsize        # h tile, double-buffered (input dtype)
            + S * H * 4                 # f32 z = tanh(h @ W1^T + b1)
            + 2 * H * itemsize          # attended output, double-buffered
            + 2 * S * itemsize)         # weights output, double-buffered


def _choose_block_b(B, S, H, itemsize, tile_budget_bytes, min_steps):
    """Batch-block size: sublane-aligned, fits the budget, (nearly) divides B."""
    B8 = _round_up(B, 8)
    per_batch = _per_batch_vmem_bytes(S, H, itemsize)
    bb = max(1, tile_budget_bytes // per_batch)
    bb = max(8, (bb // 8) * 8)
    bb = min(bb, B8)
    n_steps = pl.cdiv(B8, bb)
    # On 2-TensorCore parts (v7x) make sure there are >= 2 grid steps when the
    # batch allows it, otherwise one TC idles under ("parallel",) semantics.
    if B8 >= 8 * min_steps:
        n_steps = max(n_steps, min_steps)
    # Re-derive bb so it (nearly) divides B8 -> minimal dead padded rows.
    bb = _round_up(pl.cdiv(B8, n_steps), 8)
    return bb


def attention_layer(hidden_states, w1, b1, w2, b2, *, block_b=None):
    """Pallas wrapper. hidden_states: (B, S, H). Returns (attended (B,H), weights (B,S,1))."""
    B, S, H = hidden_states.shape
    dtype = hidden_states.dtype
    itemsize = jnp.dtype(dtype).itemsize

    # ---- generation-aware VMEM target -----------------------------------------
    try:
        vmem_cap = int(pltpu.get_tpu_info().vmem_capacity_bytes)
    except Exception:
        vmem_cap = 64 << 20                       # conservative (v7x-sized part)
    if vmem_cap <= (64 << 20):
        vmem_target = 40 << 20                    # v7x: stay well under 64 MiB
        min_steps = 2                             # 2 TCs -> want >= 2 grid steps
    else:
        vmem_target = 96 << 20                    # v5e/v6e: 128 MiB physical
        min_steps = 1

    # Resident (not per-step) VMEM: single-buffered W1^T + b1/w2 rows + slack.
    resident = H * H * itemsize + 4 * H * itemsize + (2 << 20)
    tile_budget = max(4 << 20, vmem_target - resident)

    bb = block_b if block_b is not None else _choose_block_b(
        B, S, H, itemsize, tile_budget, min_steps)
    B_pad = _round_up(B, bb)
    if B_pad != B:
        hidden_states = jnp.pad(hidden_states, ((0, B_pad - B), (0, 0), (0, 0)))

    # Pre-transpose W1 once (PyTorch Linear: y = x @ W^T + b).
    w1t = jnp.asarray(w1, dtype).T.reshape(H, H)
    b1_row = jnp.asarray(b1, dtype).reshape(1, H)
    w2_row = jnp.asarray(w2, dtype).reshape(1, H)
    b2_s = jnp.asarray(b2, jnp.float32).reshape(1)

    grid = (B_pad // bb,)

    block_bytes = bb * _per_batch_vmem_bytes(S, H, itemsize) + resident
    vmem_limit = int(min(max(block_bytes + (4 << 20), 32 << 20), vmem_target))

    def _run(single_buffer_invariant):
        inv = {"pipeline_mode": pl.Buffered(1)} if single_buffer_invariant else {}
        in_specs = [
            pl.BlockSpec((bb, S, H), lambda b: (b, 0, 0)),              # hidden_states
            pl.BlockSpec((H, H), lambda b: (0, 0), **inv),              # W1^T (grid-invariant)
            pl.BlockSpec((1, H), lambda b: (0, 0), **inv),              # b1
            pl.BlockSpec((1, H), lambda b: (0, 0), **inv),              # W2 row
            pl.BlockSpec(memory_space=pltpu.MemorySpace.SMEM),          # b2 scalar
        ]
        out_specs = [
            pl.BlockSpec((bb, H), lambda b: (b, 0)),                    # attended
            pl.BlockSpec((bb, S), lambda b: (b, 0)),                    # weights (lane-dense)
        ]
        return pl.pallas_call(
            _attention_kernel,
            out_shape=(
                jax.ShapeDtypeStruct((B_pad, H), dtype),
                jax.ShapeDtypeStruct((B_pad, S), dtype),
            ),
            grid_spec=pltpu.PrefetchScalarGridSpec(
                num_scalar_prefetch=0,
                grid=grid,
                in_specs=in_specs,
                out_specs=out_specs,
            ),
            compiler_params=pltpu.CompilerParams(
                dimension_semantics=("parallel",),
                vmem_limit_bytes=vmem_limit,
            ),
        )(hidden_states, w1t, b1_row, w2_row, b2_s)

    try:
        attended_p, weights_p = _run(True)
    except Exception:
        # Fallback for jax builds where pipeline_mode / Buffered(1) is unsupported.
        attended_p, weights_p = _run(False)

    attended = attended_p[:B]
    attention_weights = weights_p[:B, :, None]      # (B, S, 1), matches PyTorch output
    return attended, attention_weights


def _reference(hidden_states, w1, b1, w2, b2):
    """Plain-JAX reference mirroring the PyTorch forward."""
    scores = jnp.tanh(hidden_states @ w1.T + b1) @ w2.T + b2   # (B, S, 1)
    attn = jax.nn.softmax(scores, axis=1)
    attended = jnp.sum(attn * hidden_states, axis=1)
    return attended, attn


if __name__ == "__main__":
    B, S, H = 2, 8, 32

    key = jax.random.PRNGKey(0)
    k_x, k_w1, k_b1, k_w2, k_b2 = jax.random.split(key, 5)

    # Deterministic parameter init (shapes follow nn.Linear(H,H), nn.Linear(H,1)).
    bound1 = 1.0 / (H ** 0.5)
    w1 = jax.random.uniform(k_w1, (H, H), jnp.float32, -bound1, bound1)
    b1 = jax.random.uniform(k_b1, (H,), jnp.float32, -bound1, bound1)
    w2 = jax.random.uniform(k_w2, (1, H), jnp.float32, -bound1, bound1)
    b2 = jax.random.uniform(k_b2, (1,), jnp.float32, -bound1, bound1)

    hidden_states = jax.random.normal(k_x, (B, S, H), jnp.float32)

    attended, attn_weights = attention_layer(hidden_states, w1, b1, w2, b2)
    jax.block_until_ready((attended, attn_weights))

    ref_att, ref_w = _reference(hidden_states, w1, b1, w2, b2)
    assert attended.shape == (B, H)
    assert attn_weights.shape == (B, S, 1)
    assert jnp.allclose(attended, ref_att, atol=1e-5, rtol=1e-5)
    assert jnp.allclose(attn_weights, ref_w, atol=1e-5, rtol=1e-5)

    print("KERNEL_OK")
</pallas_src>

<mosaic_0001>
module attributes {stable_mosaic.version = 11 : i64} {
  func.func @_attention_kernel(%arg0: i32, %arg1: memref<8x8x32xf32, #tpu.memory_space<vmem>>, %arg2: memref<32x32xf32, #tpu.memory_space<vmem>>, %arg3: memref<1x32xf32, #tpu.memory_space<vmem>>, %arg4: memref<1x32xf32, #tpu.memory_space<vmem>>, %arg5: memref<1xf32, #tpu.memory_space<smem>>, %arg6: memref<8x32xf32, #tpu.memory_space<vmem>>, %arg7: memref<8x8xf32, #tpu.memory_space<vmem>>) attributes {dimension_semantics = [#tpu.dimension_semantics<parallel>], iteration_bounds = array<i64: 1>, scalar_prefetch = 0 : i64, scratch_operands = 0 : i64, tpu.core_type = #tpu.core_type<tc>, window_params = [{transform_indices = @transform_0, window_bounds = array<i64: 8, 8, 32>}, {pipeline_mode = #tpu.pipeline_mode<synchronous>, transform_indices = @transform_1, window_bounds = array<i64: 32, 32>}, {pipeline_mode = #tpu.pipeline_mode<synchronous>, transform_indices = @transform_2, window_bounds = array<i64: 1, 32>}, {pipeline_mode = #tpu.pipeline_mode<synchronous>, transform_indices = @transform_3, window_bounds = array<i64: 1, 32>}, {transform_indices = @transform_4, window_bounds = array<i64: 1>}, {transform_indices = @transform_5, window_bounds = array<i64: 8, 32>}, {transform_indices = @transform_6, window_bounds = array<i64: 8, 8>}]} {
    %c0 = arith.constant 0 : index
    %c0_0 = arith.constant 0 : index
    %c0_1 = arith.constant 0 : index
    %0 = vector.load %arg1[%c0, %c0_0, %c0_1] : memref<8x8x32xf32, #tpu.memory_space<vmem>>, vector<8x8x32xf32>
    %1 = vector.shape_cast %0 : vector<8x8x32xf32> to vector<64x32xf32>
    %c0_2 = arith.constant 0 : index
    %c0_3 = arith.constant 0 : index
    %2 = vector.load %arg2[%c0_2, %c0_3] : memref<32x32xf32, #tpu.memory_space<vmem>>, vector<32x32xf32>
    %cst = arith.constant dense<0.000000e+00> : vector<64x32xf32>
    %3 = tpu.matmul %1, %2, %cst {dimension_numbers = #tpu.dot_dimension_numbers<[1], [0], [0], [1], [0, 0, 1, 1], [], []>} : vector<64x32xf32>, vector<32x32xf32>, vector<64x32xf32> -> vector<64x32xf32>
    %4 = vector.shape_cast %3 : vector<64x32xf32> to vector<8x8x32xf32>
    %c0_4 = arith.constant 0 : index
    %c0_5 = arith.constant 0 : index
    %5 = vector.load %arg3[%c0_4, %c0_5] : memref<1x32xf32, #tpu.memory_space<vmem>>, vector<1x32xf32>
    %6 = vector.shape_cast %5 : vector<1x32xf32> to vector<1x1x32xf32>
    %7 = vector.broadcast %6 : vector<1x1x32xf32> to vector<8x8x32xf32>
    %8 = arith.addf %4, %7 : vector<8x8x32xf32>
    %9 = math.tanh %8 : vector<8x8x32xf32>
    %c0_6 = arith.constant 0 : index
    %c0_7 = arith.constant 0 : index
    %10 = vector.load %arg4[%c0_6, %c0_7] : memref<1x32xf32, #tpu.memory_space<vmem>>, vector<1x32xf32>
    %11 = vector.shape_cast %10 : vector<1x32xf32> to vector<1x1x32xf32>
    %12 = vector.broadcast %11 : vector<1x1x32xf32> to vector<8x8x32xf32>
    %13 = arith.mulf %9, %12 : vector<8x8x32xf32>
    %cst_8 = arith.constant dense<0.000000e+00> : vector<8x8xf32>
    %14 = vector.multi_reduction <add>, %13, %cst_8 [2] : vector<8x8x32xf32> to vector<8x8xf32>
    %c0_9 = arith.constant 0 : index
    %15 = memref.load %arg5[%c0_9] : memref<1xf32, #tpu.memory_space<smem>>
    %16 = vector.broadcast %15 : f32 to vector<8x8xf32>
    %17 = arith.addf %14, %16 : vector<8x8xf32>
    %cst_10 = arith.constant dense<0xFF800000> : vector<8xf32>
    %18 = vector.multi_reduction <maximumf>, %17, %cst_10 [1] : vector<8x8xf32> to vector<8xf32>
    %19 = vector.shape_cast %18 : vector<8xf32> to vector<8x1xf32>
    %20 = vector.broadcast %19 : vector<8x1xf32> to vector<8x8xf32>
    %21 = arith.subf %17, %20 : vector<8x8xf32>
    %22 = math.exp %21 : vector<8x8xf32>
    %cst_11 = arith.constant dense<0.000000e+00> : vector<8xf32>
    %23 = vector.multi_reduction <add>, %22, %cst_11 [1] : vector<8x8xf32> to vector<8xf32>
    %24 = vector.shape_cast %23 : vector<8xf32> to vector<8x1xf32>
    %25 = tpu.reciprocal %24 : vector<8x1xf32> -> vector<8x1xf32>
    %26 = vector.broadcast %25 : vector<8x1xf32> to vector<8x8xf32>
    %27 = arith.mulf %22, %26 : vector<8x8xf32>
    %28 = vector.shape_cast %27 : vector<8x8xf32> to vector<8x8x1xf32>
    %29 = vector.broadcast %28 : vector<8x8x1xf32> to vector<8x8x32xf32>
    %30 = arith.mulf %29, %0 : vector<8x8x32xf32>
    %cst_12 = arith.constant dense<0.000000e+00> : vector<8x32xf32>
    %31 = vector.multi_reduction <add>, %30, %cst_12 [1] : vector<8x8x32xf32> to vector<8x32xf32>
    %c0_13 = arith.constant 0 : index
    %c0_14 = arith.constant 0 : index
    %32 = vector.load %arg7[%c0_13, %c0_14] : memref<8x8xf32, #tpu.memory_space<vmem>>, vector<8x8xf32>
    tpu.vector_store %arg7[%c0_13, %c0_14], %27 {strides = array<i32>} : memref<8x8xf32, #tpu.memory_space<vmem>>, vector<8x8xf32>,
    %c0_15 = arith.constant 0 : index
    %c0_16 = arith.constant 0 : index
    %33 = vector.load %arg6[%c0_15, %c0_16] : memref<8x32xf32, #tpu.memory_space<vmem>>, vector<8x32xf32>
    tpu.vector_store %arg6[%c0_15, %c0_16], %31 {strides = array<i32>} : memref<8x32xf32, #tpu.memory_space<vmem>>, vector<8x32xf32>,
    return
  }
  func.func @transform_0(%arg0: i32) -> (i32, i32, i32) {
    %c0_i32 = arith.constant 0 : i32
    %c0_i32_0 = arith.constant 0 : i32
    %c0_i32_1 = arith.constant 0 : i32
    return %arg0, %c0_i32, %c0_i32_0 : i32, i32, i32
  }
  func.func @transform_1(%arg0: i32) -> (i32, i32) {
    %c0_i32 = arith.constant 0 : i32
    %c0_i32_0 = arith.constant 0 : i32
    %c0_i32_1 = arith.constant 0 : i32
    return %c0_i32, %c0_i32_0 : i32, i32
  }
  func.func @transform_2(%arg0: i32) -> (i32, i32) {
    %c0_i32 = arith.constant 0 : i32
    %c0_i32_0 = arith.constant 0 : i32
    %c0_i32_1 = arith.constant 0 : i32
    return %c0_i32, %c0_i32_0 : i32, i32
  }
  func.func @transform_3(%arg0: i32) -> (i32, i32) {
    %c0_i32 = arith.constant 0 : i32
    %c0_i32_0 = arith.constant 0 : i32
    %c0_i32_1 = arith.constant 0 : i32
    return %c0_i32, %c0_i32_0 : i32, i32
  }
  func.func @transform_4(%arg0: i32) -> i32 {
    %c0_i32 = arith.constant 0 : i32
    %c0_i32_0 = arith.constant 0 : i32
    return %c0_i32 : i32
  }
  func.func @transform_5(%arg0: i32) -> (i32, i32) {
    %c0_i32 = arith.constant 0 : i32
    %c0_i32_0 = arith.constant 0 : i32
    return %arg0, %c0_i32 : i32, i32
  }
  func.func @transform_6(%arg0: i32) -> (i32, i32) {
    %c0_i32 = arith.constant 0 : i32
    %c0_i32_0 = arith.constant 0 : i32
    return %arg0, %c0_i32 : i32, i32
  }
}

module attributes {stable_mosaic.version = 11 : i64} {
  func.func @_attention_kernel(%arg0: i32, %arg1: memref<8x8x32xf32, #tpu.memory_space<vmem>>, %arg2: memref<32x32xf32, #tpu.memory_space<vmem>>, %arg3: memref<1x32xf32, #tpu.memory_space<vmem>>, %arg4: memref<1x32xf32, #tpu.memory_space<vmem>>, %arg5: memref<1xf32, #tpu.memory_space<smem>>, %arg6: memref<8x32xf32, #tpu.memory_space<vmem>>, %arg7: memref<8x8xf32, #tpu.memory_space<vmem>>) attributes {dimension_semantics = [#tpu.dimension_semantics<parallel>], iteration_bounds = array<i64: 1>, scalar_prefetch = 0 : i64, scratch_operands = 0 : i64, tpu.core_type = #tpu.core_type<tc>, window_params = [{transform_indices = @transform_0, window_bounds = array<i64: 8, 8, 32>}, {pipeline_mode = #tpu.pipeline_mode<synchronous>, transform_indices = @transform_1, window_bounds = array<i64: 32, 32>}, {pipeline_mode = #tpu.pipeline_mode<synchronous>, transform_indices = @transform_2, window_bounds = array<i64: 1, 32>}, {pipeline_mode = #tpu.pipeline_mode<synchronous>, transform_indices = @transform_3, window_bounds = array<i64: 1, 32>}, {transform_indices = @transform_4, window_bounds = array<i64: 1>}, {transform_indices = @transform_5, window_bounds = array<i64: 8, 32>}, {transform_indices = @transform_6, window_bounds = array<i64: 8, 8>}]} {
    %c0 = arith.constant 0 : index
    %c0_0 = arith.constant 0 : index
    %c0_1 = arith.constant 0 : index
    %0 = vector.load %arg1[%c0, %c0_0, %c0_1] : memref<8x8x32xf32, #tpu.memory_space<vmem>>, vector<8x8x32xf32>
    %1 = vector.shape_cast %0 : vector<8x8x32xf32> to vector<64x32xf32>
    %c0_2 = arith.constant 0 : index
    %c0_3 = arith.constant 0 : index
    %2 = vector.load %arg2[%c0_2, %c0_3] : memref<32x32xf32, #tpu.memory_space<vmem>>, vector<32x32xf32>
    %cst = arith.constant dense<0.000000e+00> : vector<64x32xf32>
    %3 = tpu.matmul %1, %2, %cst {dimension_numbers = #tpu.dot_dimension_numbers<[1], [0], [0], [1], [0, 0, 1, 1], [], []>} : vector<64x32xf32>, vector<32x32xf32>, vector<64x32xf32> -> vector<64x32xf32>
    %4 = vector.shape_cast %3 : vector<64x32xf32> to vector<8x8x32xf32>
    %c0_4 = arith.constant 0 : index
    %c0_5 = arith.constant 0 : index
    %5 = vector.load %arg3[%c0_4, %c0_5] : memref<1x32xf32, #tpu.memory_space<vmem>>, vector<1x32xf32>
    %6 = vector.shape_cast %5 : vector<1x32xf32> to vector<1x1x32xf32>
    %7 = vector.broadcast %6 : vector<1x1x32xf32> to vector<8x8x32xf32>
    %8 = arith.addf %4, %7 : vector<8x8x32xf32>
    %9 = math.tanh %8 : vector<8x8x32xf32>
    %c0_6 = arith.constant 0 : index
    %c0_7 = arith.constant 0 : index
    %10 = vector.load %arg4[%c0_6, %c0_7] : memref<1x32xf32, #tpu.memory_space<vmem>>, vector<1x32xf32>
    %11 = vector.shape_cast %10 : vector<1x32xf32> to vector<1x1x32xf32>
    %12 = vector.broadcast %11 : vector<1x1x32xf32> to vector<8x8x32xf32>
    %13 = arith.mulf %9, %12 : vector<8x8x32xf32>
    %cst_8 = arith.constant dense<0.000000e+00> : vector<8x8xf32>
    %14 = vector.multi_reduction <add>, %13, %cst_8 [2] : vector<8x8x32xf32> to vector<8x8xf32>
    %c0_9 = arith.constant 0 : index
    %15 = memref.load %arg5[%c0_9] : memref<1xf32, #tpu.memory_space<smem>>
    %16 = vector.broadcast %15 : f32 to vector<8x8xf32>
    %17 = arith.addf %14, %16 : vector<8x8xf32>
    %cst_10 = arith.constant dense<0xFF800000> : vector<8xf32>
    %18 = vector.multi_reduction <maximumf>, %17, %cst_10 [1] : vector<8x8xf32> to vector<8xf32>
    %19 = vector.shape_cast %18 : vector<8xf32> to vector<8x1xf32>
    %20 = vector.broadcast %19 : vector<8x1xf32> to vector<8x8xf32>
    %21 = arith.subf %17, %20 : vector<8x8xf32>
    %22 = math.exp %21 : vector<8x8xf32>
    %cst_11 = arith.constant dense<0.000000e+00> : vector<8xf32>
    %23 = vector.multi_reduction <add>, %22, %cst_11 [1] : vector<8x8xf32> to vector<8xf32>
    %24 = vector.shape_cast %23 : vector<8xf32> to vector<8x1xf32>
    %25 = tpu.reciprocal %24 : vector<8x1xf32> -> vector<8x1xf32>
    %26 = vector.broadcast %25 : vector<8x1xf32> to vector<8x8xf32>
    %27 = arith.mulf %22, %26 : vector<8x8xf32>
    %28 = vector.shape_cast %27 : vector<8x8xf32> to vector<8x8x1xf32>
    %29 = vector.broadcast %28 : vector<8x8x1xf32> to vector<8x8x32xf32>
    %30 = arith.mulf %29, %0 : vector<8x8x32xf32>
    %cst_12 = arith.constant dense<0.000000e+00> : vector<8x32xf32>
    %31 = vector.multi_reduction <add>, %30, %cst_12 [1] : vector<8x8x32xf32> to vector<8x32xf32>
    %c0_13 = arith.constant 0 : index
    %c0_14 = arith.constant 0 : index
    %32 = vector.load %arg7[%c0_13, %c0_14] : memref<8x8xf32, #tpu.memory_space<vmem>>, vector<8x8xf32>
    tpu.vector_store %arg7[%c0_13, %c0_14], %27 {strides = array<i32>} : memref<8x8xf32, #tpu.memory_space<vmem>>, vector<8x8xf32>,
    %c0_15 = arith.constant 0 : index
    %c0_16 = arith.constant 0 : index
    %33 = vector.load %arg6[%c0_15, %c0_16] : memref<8x32xf32, #tpu.memory_space<vmem>>, vector<8x32xf32>
    tpu.vector_store %arg6[%c0_15, %c0_16], %31 {strides = array<i32>} : memref<8x32xf32, #tpu.memory_space<vmem>>, vector<8x32xf32>,
    return
  }
  func.func @transform_0(%arg0: i32) -> (i32, i32, i32) {
    %c0_i32 = arith.constant 0 : i32
    %c0_i32_0 = arith.constant 0 : i32
    %c0_i32_1 = arith.constant 0 : i32
    return %arg0, %c0_i32, %c0_i32_0 : i32, i32, i32
  }
  func.func @transform_1(%arg0: i32) -> (i32, i32) {
    %c0_i32 = arith.constant 0 : i32
    %c0_i32_0 = arith.constant 0 : i32
    %c0_i32_1 = arith.constant 0 : i32
    return %c0_i32, %c0_i32_0 : i32, i32
  }
  func.func @transform_2(%arg0: i32) -> (i32, i32) {
    %c0_i32 = arith.constant 0 : i32
    %c0_i32_0 = arith.constant 0 : i32
    %c0_i32_1 = arith.constant 0 : i32
    return %c0_i32, %c0_i32_0 : i32, i32
  }
  func.func @transform_3(%arg0: i32) -> (i32, i32) {
    %c0_i32 = arith.constant 0 : i32
    %c0_i32_0 = arith.constant 0 : i32
    %c0_i32_1 = arith.constant 0 : i32
    return %c0_i32, %c0_i32_0 : i32, i32
  }
  func.func @transform_4(%arg0: i32) -> i32 {
    %c0_i32 = arith.constant 0 : i32
    %c0_i32_0 = arith.constant 0 : i32
    return %c0_i32 : i32
  }
  func.func @transform_5(%arg0: i32) -> (i32, i32) {
    %c0_i32 = arith.constant 0 : i32
    %c0_i32_0 = arith.constant 0 : i32
    return %arg0, %c0_i32 : i32, i32
  }
  func.func @transform_6(%arg0: i32) -> (i32, i32) {
    %c0_i32 = arith.constant 0 : i32
    %c0_i32_0 = arith.constant 0 : i32
    return %arg0, %c0_i32 : i32, i32
  }
}

</mosaic_0001>

<bundles_post_ra>
// kernel: tpu_custom_call.1
= control target key start
LH: loop header
LB: loop body
LE: loop exit
PB: predicated region body
PF: predicated region fallthrough
CT: control target
= control target key end

     0   :  { %13 = vsyncpa [#allocation4], 0  ;;  %s1171_s0 = inlined_call_operand.hbm [shape: f32[8,8,32], index: 0, kind: input, shape index: {}]   ;;  %s1172_s1 = inlined_call_operand.hbm [shape: f32[32,32], index: 1, kind: input, shape index: {}]   ;;  %s1173_s2 = inlined_call_operand.vmem [shape: f32[1,32], index: 2, kind: input, shape index: {}]   ;;  %s1174_s3 = inlined_call_operand.vmem [shape: f32[1,32], index: 3, kind: input, shape index: {}]   ;;  %s1175_s4 = inlined_call_operand.<no memory space> [shape: f32[1], index: 4, kind: input, shape index: {}]   ;;  %s1176_s5 = inlined_call_operand.hbm [shape: f32[8,32], index: 5, kind: output, shape index: {0}]   ;;  %s1177_s6 = inlined_call_operand.hbm [shape: f32[8,8], index: 6, kind: output, shape index: {1}]  }
   0x1   :  { %14 = vsyncpa [#allocation7], 0 }
   0x2   :  { %15 = vsyncpa [#allocation5], 0 }
   0x3   :  { %16 = vsyncpa [#allocation10], 0  ;;  %s903_s21 = smov [#allocation3]   ;;  %s807_s25 = scalar_lea.hbm %s1171_s0, 1024 }
   0x4   :  { %s22_s22 = sshll.u32 %s903_s21, 4  ;;  %p808_p0 = scmp.ne.s32.totalorder %s1171_s0, %s807_s25  ;;  %s23_s22 = int_to_ptr.vmem [resolvable:$true] %s22_s22 }
   0x5   :  { %p811_p1 = scmp.lt.u32.totalorder %s807_s25, %s1171_s0 }
   0x7   :  { %p813_p2 = pnand %p811_p1, %p808_p0 }
   0x9   :  { %816 = shalt.err (!%p813_p2)
}
   0xa   :  { %s817_s30 = scalar_lea.vmem %s23_s22, 1024  ;;  %p822_p4 = scmp.lt.s32.totalorder %s23_s22, %s23_s22 }
   0xb   :  { %p818_p3 = scmp.ne.s32.totalorder %s23_s22, %s817_s30  ;;  %p823_p5 = scmp.lt.s32.totalorder %s817_s30, %s817_s30 }
   0xd   :  { %p824_p6 = por %p823_p5, %p822_p4 }
   0xf   :  { %p825_p7 = pnand %p824_p6, %p818_p3 }
  0x11   :  { %828 = shalt.err (!%p825_p7)
}
  0x12   :  { %s904_s7 = smov 128   ;;  %s905_s8 = smov 8  }
  0x13   :  { %28 = dma.hbm_to_vmem [thread:$0]  %s1171_s0, 1024, %s23_s22, [#allocation4], %s904_s7, %s904_s7, %s905_s8  }
  0x14   :  { %s906_s11 = smov [#allocation6]   ;;  %s829_s15 = scalar_lea.hbm %s1172_s1, 512 }
  0x15   :  { %s34_s12 = sshll.u32 %s906_s11, 4  ;;  %p830_p8 = scmp.ne.s32.totalorder %s1172_s1, %s829_s15  ;;  %s35_s12 = int_to_ptr.vmem [resolvable:$true] %s34_s12 }
  0x16   :  { %p833_p9 = scmp.lt.u32.totalorder %s829_s15, %s1172_s1 }
  0x18   :  { %p835_p10 = pnand %p833_p9, %p830_p8 }
  0x1a   :  { %838 = shalt.err (!%p835_p10)
}
  0x1b   :  { %s839_s20 = scalar_lea.vmem %s35_s12, 512  ;;  %p844_p12 = scmp.lt.s32.totalorder %s35_s12, %s35_s12 }
  0x1c   :  { %p840_p11 = scmp.ne.s32.totalorder %s35_s12, %s839_s20  ;;  %p845_p13 = scmp.lt.s32.totalorder %s839_s20, %s839_s20 }
  0x1e   :  { %p846_p0 = por %p845_p13, %p844_p12 }
  0x20   :  { %p847_p1 = pnand %p846_p0, %p840_p11 }
  0x22   :  { %850 = shalt.err (!%p847_p1)
}
  0x23   :  { %40 = dma.hbm_to_vmem [thread:$0]  %s1172_s1, 512, %s35_s12, [#allocation7], %s904_s7, %s904_s7, %s905_s8  }
  0x24   :  { %895 = dma.done.wait [#allocation4], 1024  }
  0x25   :  { %896 = vsyncadd [#allocation4], 4294966272 }
  0x26   :  { %897 = dma.done.wait [#allocation7], 512  }
  0x27   :  { %898 = vsyncadd [#allocation7], 4294966784  ;;  %vm65_vm0 = vcmask 261120   ;;  %v61_v0 = vld [vmem:[#allocation6] sm:$0xff]  ;;  %v62_v1 = vld [vmem:[#allocation6 + $0x8] sm:$0xff]  ;;  %v275_v56 = vlaneseq  ;;  %v258_v60 = vstv %s1175_s4  ;;  %vm309_vm1 = vcmask 1041409  }
  0x28   :  { %v63_v2 = vld [vmem:[#allocation6 + $0x10] sm:$0xff]  ;;  %v752_v3 = vpack.c.bf16 %v62_v1, %v61_v0  ;;  %v64_v4 = vld [vmem:[#allocation6 + $0x18] sm:$0xff]  ;;  %v969_v5 = vld [vmem:[#allocation3] sm:$0xff]  ;;  %vm311_vm2 = vcmask 1042434   ;;  %vm313_vm3 = vcmask 1043459   ;;  %vm315_vm4 = vcmask 1044484  }
  0x29   :  { %v756_v6 = vpack.c.bf16 %v64_v4, %v63_v2  ;;  %740 = vmatprep.mubr.msk.f32.mxu0 %vm65_vm0, %v969_v5  ;;  %v973_v7 = vld [vmem:[#allocation3 + $0x20] sm:$0xff]  ;;  %v977_v8 = vld [vmem:[#allocation3 + $0x8] sm:$0xff]  ;;  %v981_v10 = vld [vmem:[#allocation3 + $0x10] sm:$0xff]  ;;  %v276_v58 = vand.u32 127, %v275_v56  ;;  %v1015_v59 = vshrl.u32 %v275_v56, 7  ;;  %vm317_vm5 = vcmask 1045509  }
  0x2a   :  { %753 = vmatprep.subr.bf16.mxu0 %v752_v3  ;;  %760 = vmatprep.subr.bf16.mxu1 %v752_v3  ;;  %v979_v9 = vld [vmem:[#allocation3 + $0x28] sm:$0xff]  ;;  %v983_v11 = vld [vmem:[#allocation3 + $0x30] sm:$0xff]  ;;  %v991_v12 = vld [vmem:[#allocation3 + $0x18] sm:$0xff]  ;;  %vm319_vm6 = vcmask 1046534   ;;  %vm321_vm7 = vcmask 1047559   ;;  %vm324_vm8 = vcmask 64512  }
  0x2b   :  { %755 = vmatpush3.bf16.msra.mxu0 %v752_v3  ;;  %762 = vmatpush3.bf16.msra.mxu1 %v752_v3  ;;  %v995_v13 = vld [vmem:[#allocation3 + $0x38] sm:$0xff]  ;;  %v718_v14 = vld [vmem:[%s1173_s2] ss:$0 sm:$0xff]  ;;  %v1021_v0 = vsub.s32 %v276_v58, %v1015_v59  ;;  %s908_s4 = smov [#allocation9]  }
  0x2c   :  { %757 = vmatprep.subr.bf16.mxu0 %v756_v6  ;;  %761 = vmatprep.subr.bf16.mxu1 %v756_v6  ;;  %v719_v31 = vld [vmem:[%s1174_s3] ss:$0 sm:$0xff]  ;;  %s696_s25 = sshll.u32 %s908_s4, 4  ;;  %s697_s25 = int_to_ptr.vmem [resolvable:$true] %s696_s25 }
  0x2d   :  { %746 = vmatprep.mubr.msk.f32.mxu1 %vm65_vm0, %v973_v7  ;;  %s851_s26 = scalar_lea.vmem %s697_s25, 128  ;;  %p856_p3 = scmp.lt.s32.totalorder %s697_s25, %s697_s25 }
  0x2e   :  { %p852_p2 = scmp.ne.s32.totalorder %s697_s25, %s851_s26  ;;  %p857_p4 = scmp.lt.s32.totalorder %s851_s26, %s851_s26 }
  0x2f   :  { %759 = vmatpush3.bf16.msra.mxu0 %v756_v6  ;;  %763 = vmatpush3.bf16.msra.mxu1 %v756_v6 }
  0x30   :  { %p858_p5 = por %p857_p4, %p856_p3 }
  0x32   :  { %741 = vmatmul.mubr.msk.f32.vlgmr.msra.gmra.mrb[0].mxu0 %vm65_vm0, %v977_v8  ;;  %747 = vmatmul.mubr.msk.f32.vlgmr.msra.gmra.mrb[0].mxu1 %vm65_vm0, %v979_v9  ;;  %p859_p6 = pnand %p858_p5, %p852_p2 }
  0x33   :  { %743 = vmatprep.mubr.msk.f32.mxu0 %vm65_vm0, %v981_v10  ;;  %749 = vmatprep.mubr.msk.f32.mxu1 %vm65_vm0, %v983_v11 }
  0x36   :  { %744 = vmatmul.mubr.msk.f32.gmra.mrb[2].mxu0 %vm65_vm0, %v991_v12  ;;  %750 = vmatmul.mubr.msk.f32.gmra.mrb[2].mxu1 %vm65_vm0, %v995_v13 }
 0x105   :  { %v742_v15 = vpop.f32.mrb[0].mxu0  ;;  %v748_v16 = vpop.f32.mrb[0].mxu1 }
 0x106   :  { %v203_v17 = vadd.f32 %v742_v15, %v718_v14  ;;  %v156_v18 = vpop.f32.mrb[1].mxu0  ;;  %v176_v19 = vpop.f32.mrb[1].mxu1  ;;  %v207_v29 = vadd.f32 %v748_v16, %v718_v14 }
 0x107   :  { %v202_v20 = vadd.f32 %v718_v14, %v156_v18  ;;  %v206_v21 = vadd.f32 %v718_v14, %v176_v19 }
 0x108   :  { %773 = vtanh.f32 %v203_v17 }
 0x109   :  { %775 = vtanh.f32 %v202_v20  ;;  %v745_v22 = vpop.f32.mrb[2].mxu0  ;;  %v751_v23 = vpop.f32.mrb[2].mxu1 }
 0x10a   :  { %v205_v24 = vadd.f32 %v745_v22, %v718_v14  ;;  %v166_v25 = vpop.f32.mrb[3].mxu0  ;;  %v186_v26 = vpop.f32.mrb[3].mxu1  ;;  %777 = vtanh.f32 %v206_v21  ;;  %v209_v30 = vadd.f32 %v751_v23, %v718_v14 }
 0x10b   :  { %v204_v27 = vadd.f32 %v718_v14, %v166_v25  ;;  %v208_v28 = vadd.f32 %v718_v14, %v186_v26 }
 0x10c   :  { %779 = vtanh.f32 %v205_v24 }
 0x10d   :  { %781 = vtanh.f32 %v204_v27 }
 0x10e   :  { %783 = vtanh.f32 %v208_v28 }
 0x10f   :  { %785 = vtanh.f32 %v207_v29 }
 0x110   :  { %787 = vtanh.f32 %v209_v30 }
 0x112   :  { %v774_v32 = vpop.eup %773 }
 0x113   :  { %v776_v33 = vpop.eup %775  ;;  %v226_v34 = vmul.f32 %v774_v32, %v719_v31 }
 0x114   :  { %v778_v35 = vpop.eup %777  ;;  %v225_v37 = vmul.f32 %v776_v33, %v719_v31 }
 0x115   :  { %v236_v36 = vsel %vm65_vm0, %v226_v34, 0.0  ;;  %v229_v41 = vmul.f32 %v778_v35, %v719_v31 }
 0x116   :  { %v780_v38 = vpop.eup %779  ;;  %237 = vadd.xlane.f32.xlu0 %v236_v36  ;;  %v233_v43 = vsel %vm65_vm0, %v225_v37, 0.0  ;;  %v907_v37 = vmov 0  }
 0x117   :  { %v782_v39 = vpop.eup %781  ;;  %v228_v40 = vmul.f32 %v780_v38, %v719_v31  ;;  %v245_v47 = vsel %vm65_vm0, %v229_v41, 0.0  ;;  %772 = vset.pattern.permute.xlu0 %v907_v37  ;;  %771 = vset.pattern.permute.xlu1 %v907_v37  ;;  %v331_v38 = vsub.s32 0, %v1015_v59  ;;  %v343_v41 = vsub.s32 3, %v1015_v59 }
 0x118   :  { %v784_v42 = vpop.eup %783  ;;  %v227_v45 = vmul.f32 %v782_v39, %v719_v31  ;;  %v335_v39 = vsub.s32 1, %v1015_v59 }
 0x119   :  { %v242_v44 = vsel %vm65_vm0, %v228_v40, 0.0  ;;  %v786_v46 = vpop.eup %785  ;;  %v231_v48 = vmul.f32 %v784_v42, %v719_v31  ;;  %v339_v40 = vsub.s32 2, %v1015_v59 }
 0x11a   :  { %234 = vadd.xlane.f32.xlu0 %v233_v43  ;;  %243 = vadd.xlane.f32.xlu1 %v242_v44  ;;  %v239_v49 = vsel %vm65_vm0, %v227_v45, 0.0  ;;  %v230_v50 = vmul.f32 %v786_v46, %v719_v31  ;;  %v788_v51 = vpop.eup %787  ;;  %v347_v46 = vsub.s32 4, %v1015_v59 }
 0x11b   :  { %v251_v52 = vsel %vm65_vm0, %v231_v48, 0.0  ;;  %v232_v54 = vmul.f32 %v788_v51, %v719_v31 }
 0x11c   :  { %v248_v53 = vsel %vm65_vm0, %v230_v50, 0.0 }
 0x11d   :  { %v254_v55 = vsel %vm65_vm0, %v232_v54, 0.0 }
 0x11e   :  { %240 = vadd.xlane.f32.xlu1 %v239_v49  ;;  %246 = vadd.xlane.f32.xlu0 %v245_v47 }
 0x122   :  { %249 = vadd.xlane.f32.xlu1 %v248_v53  ;;  %252 = vadd.xlane.f32.xlu0 %v251_v52  ;;  %v351_v53 = vsub.s32 5, %v1015_v59 }
 0x126   :  { %255 = vadd.xlane.f32.xlu1 %v254_v55 }
 0x1a3   :  { %v238_v57 = vpop.xlane.xlu0 %237 }
 0x1a4   :  { %v260_v1 = vadd.f32 %v258_v60, %v238_v57  ;;  %v355_v57 = vsub.s32 6, %v1015_v59 }
 0x1a6   :  { %v284_v16 = vrot.slane %v260_v1, %v1021_v0 }
 0x1a7   :  { %v235_v61 = vpop.xlane.xlu0 %234  ;;  %v244_v62 = vpop.xlane.xlu1 %243 }
 0x1a8   :  { %v259_v63 = vadd.f32 %v258_v60, %v235_v61  ;;  %v1024_v3 = vadd.f32 %v258_v60, %v244_v62  ;;  %v359_v62 = vsub.s32 7, %v1015_v59 }
 0x1aa   :  { %v280_v2 = vrot.slane %v259_v63, %v1021_v0  ;;  %v292_v20 = vrot.slane %v1024_v3, %v1021_v0 }
 0x1ab   :  { %v241_v4 = vpop.xlane.xlu1 %240  ;;  %v247_v6 = vpop.xlane.xlu0 %246 }
 0x1ac   :  { %v261_v14 = vadd.f32 %v258_v60, %v241_v4  ;;  %v1026_v15 = vadd.f32 %v258_v60, %v247_v6  ;;  %v310_v19 = vsel %vm309_vm1, %v284_v16, %v280_v2 }
 0x1ae   :  { %v288_v17 = vrot.slane %v261_v14, %v1021_v0  ;;  %v296_v18 = vrot.slane %v1026_v15, %v1021_v0 }
 0x1af   :  { %v250_v21 = vpop.xlane.xlu1 %249  ;;  %v253_v22 = vpop.xlane.xlu0 %252 }
 0x1b0   :  { %v312_v23 = vsel %vm311_vm2, %v288_v17, %v310_v19  ;;  %v264_v24 = vadd.f32 %v258_v60, %v250_v21  ;;  %v1036_v25 = vadd.f32 %v258_v60, %v253_v22 }
 0x1b1   :  { %v314_v26 = vsel %vm313_vm3, %v292_v20, %v312_v23 }
 0x1b2   :  { %v316_v27 = vsel %vm315_vm4, %v296_v18, %v314_v26  ;;  %v300_v28 = vrot.slane %v264_v24, %v1021_v0  ;;  %v304_v29 = vrot.slane %v1036_v25, %v1021_v0 }
 0x1b3   :  { %v256_v30 = vpop.xlane.xlu1 %255 }
 0x1b4   :  { %v266_v31 = vadd.f32 %v258_v60, %v256_v30  ;;  %v318_v32 = vsel %vm317_vm5, %v300_v28, %v316_v27 }
 0x1b5   :  { %v320_v34 = vsel %vm319_vm6, %v304_v29, %v318_v32 }
 0x1b6   :  { %v308_v33 = vrot.slane %v266_v31, %v1021_v0 }
 0x1b8   :  { %v322_v35 = vsel %vm321_vm7, %v308_v33, %v320_v34 }
 0x1b9   :  { %v325_v36 = vsel %vm324_vm8, %v322_v35, -inf }
 0x1ba   :  { %326 = vmax.xlane.f32.xlu0 %v325_v36 }
 0x247   :  { %v327_v42 = vpop.xlane.xlu0 %326 }
 0x248   :  { %v332_v43 = vrot.slane %v327_v42, %v331_v38  ;;  %v336_v44 = vrot.slane %v327_v42, %v335_v39  ;;  %v340_v45 = vrot.slane %v327_v42, %v339_v40  ;;  %v344_v47 = vrot.slane %v327_v42, %v343_v41 }
 0x249   :  { %v348_v54 = vrot.slane %v327_v42, %v347_v46  ;;  %v352_v58 = vrot.slane %v327_v42, %v351_v53  ;;  %v360_v6 = vrot.slane %v327_v42, %v359_v62 }
 0x24a   :  { %v369_v48 = vsub.f32 %v259_v63, %v332_v43  ;;  %v370_v49 = vsub.f32 %v260_v1, %v336_v44  ;;  %v371_v50 = vsub.f32 %v261_v14, %v340_v45  ;;  %v372_v55 = vsub.f32 %v1024_v3, %v344_v47 }
 0x24b   :  { %v373_v60 = vsub.f32 %v1026_v15, %v348_v54  ;;  %v356_v63 = vrot.slane %v327_v42, %v355_v57  ;;  %v374_v1 = vsub.f32 %v264_v24, %v352_v58  ;;  %v376_v17 = vsub.f32 %v266_v31, %v360_v6 }
 0x24c   :  { %v377_v51 = vmul.f32 1.442695, %v369_v48  ;;  %v379_v52 = vmul.f32 1.442695, %v370_v49  ;;  %v381_v56 = vmul.f32 1.442695, %v371_v50 }
 0x24d   :  { %v383_v61 = vmul.f32 1.442695, %v372_v55  ;;  %v385_v2 = vmul.f32 1.442695, %v373_v60  ;;  %v375_v14 = vsub.f32 %v1036_v25, %v356_v63  ;;  %v387_v15 = vmul.f32 1.442695, %v374_v1 }
 0x24e   :  { %789 = vpow2.f32 %v377_v51  ;;  %v391_v20 = vmul.f32 1.442695, %v376_v17 }
 0x24f   :  { %791 = vpow2.f32 %v379_v52  ;;  %v389_v18 = vmul.f32 1.442695, %v375_v14 }
 0x250   :  { %793 = vpow2.f32 %v381_v56 }
 0x251   :  { %795 = vpow2.f32 %v383_v61 }
 0x252   :  { %797 = vpow2.f32 %v385_v2 }
 0x253   :  { %799 = vpow2.f32 %v387_v15 }
 0x254   :  { %801 = vpow2.f32 %v389_v18 }
 0x255   :  { %803 = vpow2.f32 %v391_v20 }
 0x258   :  { %v790_v3 = vpop.eup %789 }
 0x259   :  { %v792_v4 = vpop.eup %791  ;;  %402 = vperm.xlu1 %771, %v790_v3  }
 0x25a   :  { %405 = vperm.xlu0 %772, %v792_v4   ;;  %v794_v16 = vpop.eup %793 }
 0x25b   :  { %v796_v19 = vpop.eup %795 }
 0x25c   :  { %v798_v21 = vpop.eup %797 }
 0x25d   :  { %408 = vperm.xlu1 %771, %v794_v16   ;;  %v800_v22 = vpop.eup %799 }
 0x25e   :  { %v802_v23 = vpop.eup %801 }
 0x25f   :  { %v804_v24 = vpop.eup %803 }
 0x261   :  { %411 = vperm.xlu1 %771, %v796_v19  }
 0x265   :  { %414 = vperm.xlu1 %771, %v798_v21  }
 0x269   :  { %417 = vperm.xlu1 %771, %v800_v22  }
 0x26d   :  { %420 = vperm.xlu1 %771, %v802_v23  }
 0x271   :  { %423 = vperm.xlu1 %771, %v804_v24  }
 0x2d8   :  { %v403_v25 = vpop.permute.xlu1 %402 }
 0x2d9   :  { %v406_v29 = vpop.permute.xlu0 %405  ;;  %v428_v32 = vrot.slane %v403_v25, %v1021_v0 }
 0x2da   :  { %v432_v31 = vrot.slane %v406_v29, %v1021_v0 }
 0x2dc   :  { %v409_v26 = vpop.permute.xlu1 %408  ;;  %v457_v37 = vsel %vm309_vm1, %v432_v31, %v428_v32 }
 0x2dd   :  { %v436_v33 = vrot.slane %v409_v26, %v1021_v0 }
 0x2df   :  { %v458_v43 = vsel %vm311_vm2, %v436_v33, %v457_v37 }
 0x2e0   :  { %v412_v27 = vpop.permute.xlu1 %411 }
 0x2e1   :  { %v440_v34 = vrot.slane %v412_v27, %v1021_v0 }
 0x2e3   :  { %v459_v45 = vsel %vm313_vm3, %v440_v34, %v458_v43 }
 0x2e4   :  { %v415_v28 = vpop.permute.xlu1 %414 }
 0x2e5   :  { %v444_v35 = vrot.slane %v415_v28, %v1021_v0 }
 0x2e7   :  { %v460_v47 = vsel %vm315_vm4, %v444_v35, %v459_v45 }
 0x2e8   :  { %v418_v30 = vpop.permute.xlu1 %417 }
 0x2e9   :  { %v448_v42 = vrot.slane %v418_v30, %v1021_v0 }
 0x2eb   :  { %v461_v49 = vsel %vm317_vm5, %v448_v42, %v460_v47 }
 0x2ec   :  { %v421_v36 = vpop.permute.xlu1 %420 }
 0x2ed   :  { %v452_v44 = vrot.slane %v421_v36, %v1021_v0 }
 0x2ef   :  { %v462_v51 = vsel %vm319_vm6, %v452_v44, %v461_v49 }
 0x2f0   :  { %v424_v48 = vpop.permute.xlu1 %423 }
 0x2f1   :  { %v456_v50 = vrot.slane %v424_v48, %v1021_v0 }
 0x2f3   :  { %v463_v52 = vsel %vm321_vm7, %v456_v50, %v462_v51 }
 0x2f4   :  { %v465_v54 = vsel %vm324_vm8, %v463_v52, 0.0 }
 0x2f5   :  { %466 = vadd.xlane.f32.xlu1 %v465_v54 }
 0x382   :  { %v467_v55 = vpop.xlane.xlu1 %466 }
 0x383   :  { %805 = vrcp.f32 %v467_v55 }
 0x38d   :  { %v806_v56 = vpop.eup %805 }
 0x38e   :  { %v473_v58 = vrot.slane %v806_v56, %v331_v38  ;;  %v477_v61 = vrot.slane %v806_v56, %v335_v39  ;;  %v481_v1 = vrot.slane %v806_v56, %v339_v40  ;;  %v485_v6 = vrot.slane %v806_v56, %v343_v41 }
 0x38f   :  { %v489_v15 = vrot.slane %v806_v56, %v347_v46  ;;  %v493_v39 = vrot.slane %v806_v56, %v351_v53  ;;  %v497_v40 = vrot.slane %v806_v56, %v355_v57  ;;  %v501_v41 = vrot.slane %v806_v56, %v359_v62 }
 0x390   :  { %v510_v60 = vmul.f32 %v790_v3, %v473_v58  ;;  %v511_v63 = vmul.f32 %v792_v4, %v477_v61  ;;  %v512_v2 = vmul.f32 %v794_v16, %v481_v1  ;;  %v513_v14 = vmul.f32 %v796_v19, %v485_v6 }
 0x391   :  { %v514_v38 = vmul.f32 %v798_v21, %v489_v15  ;;  %v515_v3 = vmul.f32 %v800_v22, %v493_v39  ;;  %v516_v4 = vmul.f32 %v802_v23, %v497_v40  ;;  %v517_v16 = vmul.f32 %v804_v24, %v501_v41 }
 0x392   :  { %520 = vperm.xlu0 %772, %v510_v60  }
 0x396   :  { %525 = vperm.xlu0 %772, %v511_v63  }
 0x39a   :  { %530 = vperm.xlu0 %772, %v512_v2  }
 0x39e   :  { %535 = vperm.xlu0 %772, %v513_v14  }
 0x3a2   :  { %540 = vperm.xlu0 %772, %v514_v38  }
 0x3a6   :  { %545 = vperm.xlu0 %772, %v515_v3  }
 0x3aa   :  { %550 = vperm.xlu0 %772, %v516_v4  }
 0x3ae   :  { %555 = vperm.xlu0 %772, %v517_v16  }
 0x411   :  { %v521_v17 = vpop.permute.xlu0 %520 }
 0x412   :  { %v558_v19 = vmul.f32 %v521_v17, %v969_v5  ;;  %v625_v35 = vrot.slane %v521_v17, %v1021_v0 }
 0x414   :  { %v566_v57 = vsel %vm65_vm0, %v558_v19, 0.0 }
 0x415   :  { %v526_v46 = vpop.permute.xlu0 %525  ;;  %v567_v24 = vrot.slane %v566_v57, 4 }
 0x416   :  { %v559_v18 = vmul.f32 %v526_v46, %v977_v8  ;;  %v629_v34 = vrot.slane %v526_v46, %v1021_v0 }
 0x418   :  { %v573_v21 = vsel %vm65_vm0, %v559_v18, 0.0  ;;  %v654_v51 = vsel %vm309_vm1, %v629_v34, %v625_v35 }
 0x419   :  { %v531_v53 = vpop.permute.xlu0 %530  ;;  %v574_v23 = vrot.slane %v573_v21, 4 }
 0x41a   :  { %v560_v20 = vmul.f32 %v531_v53, %v981_v10  ;;  %v568_v10 = vadd.f32 %v567_v24, %v566_v57  ;;  %v633_v37 = vrot.slane %v531_v53, %v1021_v0 }
 0x41b   :  { %v575_v28 = vadd.f32 %v574_v23, %v573_v21 }
 0x41c   :  { %v580_v22 = vsel %vm65_vm0, %v560_v20, 0.0  ;;  %v569_v43 = vrot.slane %v568_v10, 2  ;;  %v655_v56 = vsel %vm311_vm2, %v633_v37, %v654_v51 }
 0x41d   :  { %v536_v59 = vpop.permute.xlu0 %535  ;;  %v581_v25 = vrot.slane %v580_v22, 4  ;;  %v576_v36 = vrot.slane %v575_v28, 2 }
 0x41e   :  { %v561_v62 = vmul.f32 %v536_v59, %v991_v12  ;;  %v637_v44 = vrot.slane %v536_v59, %v1021_v0  ;;  %v570_v61 = vadd.f32 %v569_v43, %v568_v10 }
 0x41f   :  { %v582_v29 = vadd.f32 %v581_v25, %v580_v22  ;;  %v577_v55 = vadd.f32 %v576_v36, %v575_v28 }
 0x420   :  { %v587_v26 = vsel %vm65_vm0, %v561_v62, 0.0  ;;  %v656_v1 = vsel %vm313_vm3, %v637_v44, %v655_v56  ;;  %v571_v20 = vrot.slane %v570_v61, 1 }
 0x421   :  { %v588_v8 = vrot.slane %v587_v26, 4  ;;  %v541_v27 = vpop.permute.xlu0 %540  ;;  %v578_v41 = vrot.slane %v577_v55, 1 }
 0x422   :  { %v562_v5 = vmul.f32 %v541_v27, %v973_v7  ;;  %v583_v7 = vrot.slane %v582_v29, 2  ;;  %v641_v48 = vrot.slane %v541_v27, %v1021_v0 }
 0x423   :  { %v589_v31 = vadd.f32 %v588_v8, %v587_v26 }
 0x424   :  { %v594_v30 = vsel %vm65_vm0, %v562_v5, 0.0  ;;  %v584_v63 = vadd.f32 %v583_v7, %v582_v29  ;;  %v657_v14 = vsel %vm315_vm4, %v641_v48, %v656_v1 }
 0x425   :  { %v595_v32 = vrot.slane %v594_v30, 4  ;;  %v546_v33 = vpop.permute.xlu0 %545  ;;  %v590_v47 = vrot.slane %v589_v31, 2 }
 0x426   :  { %v563_v12 = vmul.f32 %v546_v33, %v979_v9  ;;  %v645_v52 = vrot.slane %v546_v33, %v1021_v0  ;;  %v585_v18 = vrot.slane %v584_v63, 1 }
 0x427   :  { %v596_v42 = vadd.f32 %v595_v32, %v594_v30  ;;  %v591_v6 = vadd.f32 %v590_v47, %v589_v31 }
 0x428   :  { %v601_v45 = vsel %vm65_vm0, %v563_v12, 0.0  ;;  %v658_v3 = vsel %vm317_vm5, %v645_v52, %v657_v14 }
 0x429   :  { %v602_v49 = vrot.slane %v601_v45, 4  ;;  %v551_v50 = vpop.permute.xlu0 %550  ;;  %v597_v9 = vrot.slane %v596_v42, 2  ;;  %v592_v21 = vrot.slane %v591_v6, 1 }
 0x42a   :  { %v564_v54 = vmul.f32 %v551_v50, %v983_v11  ;;  %v649_v60 = vrot.slane %v551_v50, %v1021_v0 }
 0x42b   :  { %v603_v58 = vadd.f32 %v602_v49, %v601_v45  ;;  %v598_v39 = vadd.f32 %v597_v9, %v596_v42 }
 0x42c   :  { %v608_v2 = vsel %vm65_vm0, %v564_v54, 0.0  ;;  %v659_v46 = vsel %vm319_vm6, %v649_v60, %v658_v3 }
 0x42d   :  { %v604_v15 = vrot.slane %v603_v58, 2  ;;  %v609_v38 = vrot.slane %v608_v2, 4  ;;  %v556_v11 = vpop.permute.xlu0 %555 }
 0x42e   :  { %v565_v40 = vmul.f32 %v556_v11, %v995_v13  ;;  %v653_v4 = vrot.slane %v556_v11, %v1021_v0  ;;  %v599_v13 = vrot.slane %v598_v39, 1 }
 0x42f   :  { %v605_v16 = vadd.f32 %v604_v15, %v603_v58  ;;  %v610_v17 = vadd.f32 %v609_v38, %v608_v2 }
 0x430   :  { %v615_v19 = vsel %vm65_vm0, %v565_v40, 0.0  ;;  %v660_v53 = vsel %vm321_vm7, %v653_v4, %v659_v46 }
 0x431   :  { %v611_v57 = vrot.slane %v610_v17, 2  ;;  %v616_v22 = vrot.slane %v615_v19, 4  ;;  %662 = vst.msk [vmem:[#allocation9] sm:$0xff] %vm324_vm8, %v660_v53 }
 0x432   :  { %862 = shalt.err (!%p859_p6)
}
 0x433   :  { %s863_s29 = scalar_lea.hbm %s1177_s6, 128 }
 0x434   :  { %p864_p7 = scmp.ne.s32.totalorder %s1177_s6, %s863_s29  ;;  %p867_p8 = scmp.lt.u32.totalorder %s863_s29, %s1177_s6 }
 0x436   :  { %p869_p9 = pnand %p867_p8, %p864_p7 }
 0x438   :  { %872 = shalt.err (!%p869_p9)
}
 0x439   :  { %699 = dma.vmem_to_hbm [thread:$0]  %s697_s25, 128, %s1177_s6, [#allocation10]   ;;  %v579_v0 = vadd.f32 %v578_v41, %v577_v55  ;;  %v606_v59 = vrot.slane %v605_v16, 1  ;;  %v612_v62 = vadd.f32 %v611_v57, %v610_v17  ;;  %v617_v23 = vadd.f32 %v616_v22, %v615_v19 }
 0x43a   :  { %v586_v24 = vadd.f32 %v585_v18, %v584_v63  ;;  %v572_v25 = vadd.f32 %v571_v20, %v570_v61  ;;  %v593_v26 = vadd.f32 %v592_v21, %v591_v6  ;;  %v600_v5 = vadd.f32 %v599_v13, %v598_v39  ;;  %s909_s6 = smov [#allocation8]  }
 0x43b   :  { %v613_v8 = vrot.slane %v612_v62, 1  ;;  %v618_v27 = vrot.slane %v617_v23, 2  ;;  %v607_v10 = vadd.f32 %v606_v59, %v605_v16  ;;  %s686_s12 = sshll.u32 %s909_s6, 4  ;;  %s687_s12 = int_to_ptr.vmem [resolvable:$true] %s686_s12 }
 0x43c   :  { %v671_v28 = vsel %vm309_vm1, %v579_v0, %v572_v25  ;;  %s873_s13 = scalar_lea.vmem %s687_s12, 128  ;;  %p878_p11 = scmp.lt.s32.totalorder %s687_s12, %s687_s12 }
 0x43d   :  { %v619_v29 = vadd.f32 %v618_v27, %v617_v23  ;;  %v672_v30 = vsel %vm311_vm2, %v586_v24, %v671_v28  ;;  %v614_v31 = vadd.f32 %v613_v8, %v612_v62  ;;  %p874_p10 = scmp.ne.s32.totalorder %s687_s12, %s873_s13  ;;  %p879_p12 = scmp.lt.s32.totalorder %s873_s13, %s873_s13 }
 0x43e   :  { %v673_v33 = vsel %vm313_vm3, %v593_v26, %v672_v30 }
 0x43f   :  { %v620_v32 = vrot.slane %v619_v29, 1  ;;  %v674_v34 = vsel %vm315_vm4, %v600_v5, %v673_v33  ;;  %p880_p13 = por %p879_p12, %p878_p11 }
 0x440   :  { %v675_v35 = vsel %vm317_vm5, %v607_v10, %v674_v34 }
 0x441   :  { %v621_v12 = vadd.f32 %v620_v32, %v619_v29  ;;  %v676_v36 = vsel %vm319_vm6, %v614_v31, %v675_v35  ;;  %p881_p0 = pnand %p880_p13, %p874_p10 }
 0x443   :  { %v677_v37 = vsel %vm321_vm7, %v621_v12, %v676_v36 }
 0x444   :  { %679 = vst.msk [vmem:[#allocation8] sm:$0xff] %vm65_vm0, %v677_v37 }
 0x445   :  { %884 = shalt.err (!%p881_p0)
}
 0x446   :  { %s885_s16 = scalar_lea.hbm %s1176_s5, 128 }
 0x447   :  { %p886_p1 = scmp.ne.s32.totalorder %s1176_s5, %s885_s16  ;;  %p889_p2 = scmp.lt.u32.totalorder %s885_s16, %s1176_s5 }
 0x449   :  { %p891_p3 = pnand %p889_p2, %p886_p1 }
 0x44b   :  { %894 = shalt.err (!%p891_p3)
}
 0x44c   :  { %689 = dma.vmem_to_hbm [thread:$0]  %s687_s12, 128, %s1176_s5, [#allocation5]  }
 0x44d   :  { %899 = dma.done.wait [#allocation5], 128  }
 0x44e   :  { %900 = vsyncadd [#allocation5], 4294967168 }
 0x44f   :  { %901 = dma.done.wait [#allocation10], 128  }
 0x450   :  { %902 = vsyncadd [#allocation10], 4294967168 }
 0x451   :  { %706 = vsyncpa [#allocation4], 1 }
 0x452   :  { %707 = vsyncpa [#allocation7], 1 }
 0x453   :  { %708 = vsyncpa [#allocation5], 1 }
 0x454   :  { %709 = vsyncpa [#allocation10], 1 }

// kernel: tpu_custom_call.1
= control target key start
LH: loop header
LB: loop body
LE: loop exit
PB: predicated region body
PF: predicated region fallthrough
CT: control target
= control target key end

     0   :  { %13 = vsyncpa [#allocation4], 0  ;;  %s1171_s0 = inlined_call_operand.hbm [shape: f32[8,8,32], index: 0, kind: input, shape index: {}]   ;;  %s1172_s1 = inlined_call_operand.hbm [shape: f32[32,32], index: 1, kind: input, shape index: {}]   ;;  %s1173_s2 = inlined_call_operand.vmem [shape: f32[1,32], index: 2, kind: input, shape index: {}]   ;;  %s1174_s3 = inlined_call_operand.vmem [shape: f32[1,32], index: 3, kind: input, shape index: {}]   ;;  %s1175_s4 = inlined_call_operand.<no memory space> [shape: f32[1], index: 4, kind: input, shape index: {}]   ;;  %s1176_s5 = inlined_call_operand.hbm [shape: f32[8,32], index: 5, kind: output, shape index: {0}]   ;;  %s1177_s6 = inlined_call_operand.hbm [shape: f32[8,8], index: 6, kind: output, shape index: {1}]  }
   0x1   :  { %14 = vsyncpa [#allocation7], 0 }
   0x2   :  { %15 = vsyncpa [#allocation5], 0 }
   0x3   :  { %16 = vsyncpa [#allocation10], 0  ;;  %s903_s21 = smov [#allocation3]   ;;  %s807_s25 = scalar_lea.hbm %s1171_s0, 1024 }
   0x4   :  { %s22_s22 = sshll.u32 %s903_s21, 4  ;;  %p808_p0 = scmp.ne.s32.totalorder %s1171_s0, %s807_s25  ;;  %s23_s22 = int_to_ptr.vmem [resolvable:$true] %s22_s22 }
   0x5   :  { %p811_p1 = scmp.lt.u32.totalorder %s807_s25, %s1171_s0 }
   0x7   :  { %p813_p2 = pnand %p811_p1, %p808_p0 }
   0x9   :  { %816 = shalt.err (!%p813_p2)
}
   0xa   :  { %s817_s30 = scalar_lea.vmem %s23_s22, 1024  ;;  %p822_p4 = scmp.lt.s32.totalorder %s23_s22, %s23_s22 }
   0xb   :  { %p818_p3 = scmp.ne.s32.totalorder %s23_s22, %s817_s30  ;;  %p823_p5 = scmp.lt.s32.totalorder %s817_s30, %s817_s30 }
   0xd   :  { %p824_p6 = por %p823_p5, %p822_p4 }
   0xf   :  { %p825_p7 = pnand %p824_p6, %p818_p3 }
  0x11   :  { %828 = shalt.err (!%p825_p7)
}
  0x12   :  { %s904_s7 = smov 128   ;;  %s905_s8 = smov 8  }
  0x13   :  { %28 = dma.hbm_to_vmem [thread:$0]  %s1171_s0, 1024, %s23_s22, [#allocation4], %s904_s7, %s904_s7, %s905_s8  }
  0x14   :  { %s906_s11 = smov [#allocation6]   ;;  %s829_s15 = scalar_lea.hbm %s1172_s1, 512 }
  0x15   :  { %s34_s12 = sshll.u32 %s906_s11, 4  ;;  %p830_p8 = scmp.ne.s32.totalorder %s1172_s1, %s829_s15  ;;  %s35_s12 = int_to_ptr.vmem [resolvable:$true] %s34_s12 }
  0x16   :  { %p833_p9 = scmp.lt.u32.totalorder %s829_s15, %s1172_s1 }
  0x18   :  { %p835_p10 = pnand %p833_p9, %p830_p8 }
  0x1a   :  { %838 = shalt.err (!%p835_p10)
}
  0x1b   :  { %s839_s20 = scalar_lea.vmem %s35_s12, 512  ;;  %p844_p12 = scmp.lt.s32.totalorder %s35_s12, %s35_s12 }
  0x1c   :  { %p840_p11 = scmp.ne.s32.totalorder %s35_s12, %s839_s20  ;;  %p845_p13 = scmp.lt.s32.totalorder %s839_s20, %s839_s20 }
  0x1e   :  { %p846_p0 = por %p845_p13, %p844_p12 }
  0x20   :  { %p847_p1 = pnand %p846_p0, %p840_p11 }
  0x22   :  { %850 = shalt.err (!%p847_p1)
}
  0x23   :  { %40 = dma.hbm_to_vmem [thread:$0]  %s1172_s1, 512, %s35_s12, [#allocation7], %s904_s7, %s904_s7, %s905_s8  }
  0x24   :  { %895 = dma.done.wait [#allocation4], 1024  }
  0x25   :  { %896 = vsyncadd [#allocation4], 4294966272 }
  0x26   :  { %897 = dma.done.wait [#allocation7], 512  }
  0x27   :  { %898 = vsyncadd [#allocation7], 4294966784  ;;  %vm65_vm0 = vcmask 261120   ;;  %v61_v0 = vld [vmem:[#allocation6] sm:$0xff]  ;;  %v62_v1 = vld [vmem:[#allocation6 + $0x8] sm:$0xff]  ;;  %v275_v56 = vlaneseq  ;;  %v258_v60 = vstv %s1175_s4  ;;  %vm309_vm1 = vcmask 1041409  }
  0x28   :  { %v63_v2 = vld [vmem:[#allocation6 + $0x10] sm:$0xff]  ;;  %v752_v3 = vpack.c.bf16 %v62_v1, %v61_v0  ;;  %v64_v4 = vld [vmem:[#allocation6 + $0x18] sm:$0xff]  ;;  %v969_v5 = vld [vmem:[#allocation3] sm:$0xff]  ;;  %vm311_vm2 = vcmask 1042434   ;;  %vm313_vm3 = vcmask 1043459   ;;  %vm315_vm4 = vcmask 1044484  }
  0x29   :  { %v756_v6 = vpack.c.bf16 %v64_v4, %v63_v2  ;;  %740 = vmatprep.mubr.msk.f32.mxu0 %vm65_vm0, %v969_v5  ;;  %v973_v7 = vld [vmem:[#allocation3 + $0x20] sm:$0xff]  ;;  %v977_v8 = vld [vmem:[#allocation3 + $0x8] sm:$0xff]  ;;  %v981_v10 = vld [vmem:[#allocation3 + $0x10] sm:$0xff]  ;;  %v276_v58 = vand.u32 127, %v275_v56  ;;  %v1015_v59 = vshrl.u32 %v275_v56, 7  ;;  %vm317_vm5 = vcmask 1045509  }
  0x2a   :  { %753 = vmatprep.subr.bf16.mxu0 %v752_v3  ;;  %760 = vmatprep.subr.bf16.mxu1 %v752_v3  ;;  %v979_v9 = vld [vmem:[#allocation3 + $0x28] sm:$0xff]  ;;  %v983_v11 = vld [vmem:[#allocation3 + $0x30] sm:$0xff]  ;;  %v991_v12 = vld [vmem:[#allocation3 + $0x18] sm:$0xff]  ;;  %vm319_vm6 = vcmask 1046534   ;;  %vm321_vm7 = vcmask 1047559   ;;  %vm324_vm8 = vcmask 64512  }
  0x2b   :  { %755 = vmatpush3.bf16.msra.mxu0 %v752_v3  ;;  %762 = vmatpush3.bf16.msra.mxu1 %v752_v3  ;;  %v995_v13 = vld [vmem:[#allocation3 + $0x38] sm:$0xff]  ;;  %v718_v14 = vld [vmem:[%s1173_s2] ss:$0 sm:$0xff]  ;;  %v1021_v0 = vsub.s32 %v276_v58, %v1015_v59  ;;  %s908_s4 = smov [#allocation9]  }
  0x2c   :  { %757 = vmatprep.subr.bf16.mxu0 %v756_v6  ;;  %761 = vmatprep.subr.bf16.mxu1 %v756_v6  ;;  %v719_v31 = vld [vmem:[%s1174_s3] ss:$0 sm:$0xff]  ;;  %s696_s25 = sshll.u32 %s908_s4, 4  ;;  %s697_s25 = int_to_ptr.vmem [resolvable:$true] %s696_s25 }
  0x2d   :  { %746 = vmatprep.mubr.msk.f32.mxu1 %vm65_vm0, %v973_v7  ;;  %s851_s26 = scalar_lea.vmem %s697_s25, 128  ;;  %p856_p3 = scmp.lt.s32.totalorder %s697_s25, %s697_s25 }
  0x2e   :  { %p852_p2 = scmp.ne.s32.totalorder %s697_s25, %s851_s26  ;;  %p857_p4 = scmp.lt.s32.totalorder %s851_s26, %s851_s26 }
  0x2f   :  { %759 = vmatpush3.bf16.msra.mxu0 %v756_v6  ;;  %763 = vmatpush3.bf16.msra.mxu1 %v756_v6 }
  0x30   :  { %p858_p5 = por %p857_p4, %p856_p3 }
  0x32   :  { %741 = vmatmul.mubr.msk.f32.vlgmr.msra.gmra.mrb[0].mxu0 %vm65_vm0, %v977_v8  ;;  %747 = vmatmul.mubr.msk.f32.vlgmr.msra.gmra.mrb[0].mxu1 %vm65_vm0, %v979_v9  ;;  %p859_p6 = pnand %p858_p5, %p852_p2 }
  0x33   :  { %743 = vmatprep.mubr.msk.f32.mxu0 %vm65_vm0, %v981_v10  ;;  %749 = vmatprep.mubr.msk.f32.mxu1 %vm65_vm0, %v983_v11 }
  0x36   :  { %744 = vmatmul.mubr.msk.f32.gmra.mrb[2].mxu0 %vm65_vm0, %v991_v12  ;;  %750 = vmatmul.mubr.msk.f32.gmra.mrb[2].mxu1 %vm65_vm0, %v995_v13 }
 0x105   :  { %v742_v15 = vpop.f32.mrb[0].mxu0  ;;  %v748_v16 = vpop.f32.mrb[0].mxu1 }
 0x106   :  { %v203_v17 = vadd.f32 %v742_v15, %v718_v14  ;;  %v156_v18 = vpop.f32.mrb[1].mxu0  ;;  %v176_v19 = vpop.f32.mrb[1].mxu1  ;;  %v207_v29 = vadd.f32 %v748_v16, %v718_v14 }
 0x107   :  { %v202_v20 = vadd.f32 %v718_v14, %v156_v18  ;;  %v206_v21 = vadd.f32 %v718_v14, %v176_v19 }
 0x108   :  { %773 = vtanh.f32 %v203_v17 }
 0x109   :  { %775 = vtanh.f32 %v202_v20  ;;  %v745_v22 = vpop.f32.mrb[2].mxu0  ;;  %v751_v23 = vpop.f32.mrb[2].mxu1 }
 0x10a   :  { %v205_v24 = vadd.f32 %v745_v22, %v718_v14  ;;  %v166_v25 = vpop.f32.mrb[3].mxu0  ;;  %v186_v26 = vpop.f32.mrb[3].mxu1  ;;  %777 = vtanh.f32 %v206_v21  ;;  %v209_v30 = vadd.f32 %v751_v23, %v718_v14 }
 0x10b   :  { %v204_v27 = vadd.f32 %v718_v14, %v166_v25  ;;  %v208_v28 = vadd.f32 %v718_v14, %v186_v26 }
 0x10c   :  { %779 = vtanh.f32 %v205_v24 }
 0x10d   :  { %781 = vtanh.f32 %v204_v27 }
 0x10e   :  { %783 = vtanh.f32 %v208_v28 }
 0x10f   :  { %785 = vtanh.f32 %v207_v29 }
 0x110   :  { %787 = vtanh.f32 %v209_v30 }
 0x112   :  { %v774_v32 = vpop.eup %773 }
 0x113   :  { %v776_v33 = vpop.eup %775  ;;  %v226_v34 = vmul.f32 %v774_v32, %v719_v31 }
 0x114   :  { %v778_v35 = vpop.eup %777  ;;  %v225_v37 = vmul.f32 %v776_v33, %v719_v31 }
 0x115   :  { %v236_v36 = vsel %vm65_vm0, %v226_v34, 0.0  ;;  %v229_v41 = vmul.f32 %v778_v35, %v719_v31 }
 0x116   :  { %v780_v38 = vpop.eup %779  ;;  %237 = vadd.xlane.f32.xlu0 %v236_v36  ;;  %v233_v43 = vsel %vm65_vm0, %v225_v37, 0.0  ;;  %v907_v37 = vmov 0  }
 0x117   :  { %v782_v39 = vpop.eup %781  ;;  %v228_v40 = vmul.f32 %v780_v38, %v719_v31  ;;  %v245_v47 = vsel %vm65_vm0, %v229_v41, 0.0  ;;  %772 = vset.pattern.permute.xlu0 %v907_v37  ;;  %771 = vset.pattern.permute.xlu1 %v907_v37  ;;  %v331_v38 = vsub.s32 0, %v1015_v59  ;;  %v343_v41 = vsub.s32 3, %v1015_v59 }
 0x118   :  { %v784_v42 = vpop.eup %783  ;;  %v227_v45 = vmul.f32 %v782_v39, %v719_v31  ;;  %v335_v39 = vsub.s32 1, %v1015_v59 }
 0x119   :  { %v242_v44 = vsel %vm65_vm0, %v228_v40, 0.0  ;;  %v786_v46 = vpop.eup %785  ;;  %v231_v48 = vmul.f32 %v784_v42, %v719_v31  ;;  %v339_v40 = vsub.s32 2, %v1015_v59 }
 0x11a   :  { %234 = vadd.xlane.f32.xlu0 %v233_v43  ;;  %243 = vadd.xlane.f32.xlu1 %v242_v44  ;;  %v239_v49 = vsel %vm65_vm0, %v227_v45, 0.0  ;;  %v230_v50 = vmul.f32 %v786_v46, %v719_v31  ;;  %v788_v51 = vpop.eup %787  ;;  %v347_v46 = vsub.s32 4, %v1015_v59 }
 0x11b   :  { %v251_v52 = vsel %vm65_vm0, %v231_v48, 0.0  ;;  %v232_v54 = vmul.f32 %v788_v51, %v719_v31 }
 0x11c   :  { %v248_v53 = vsel %vm65_vm0, %v230_v50, 0.0 }
 0x11d   :  { %v254_v55 = vsel %vm65_vm0, %v232_v54, 0.0 }
 0x11e   :  { %240 = vadd.xlane.f32.xlu1 %v239_v49  ;;  %246 = vadd.xlane.f32.xlu0 %v245_v47 }
 0x122   :  { %249 = vadd.xlane.f32.xlu1 %v248_v53  ;;  %252 = vadd.xlane.f32.xlu0 %v251_v52  ;;  %v351_v53 = vsub.s32 5, %v1015_v59 }
 0x126   :  { %255 = vadd.xlane.f32.xlu1 %v254_v55 }
 0x1a3   :  { %v238_v57 = vpop.xlane.xlu0 %237 }
 0x1a4   :  { %v260_v1 = vadd.f32 %v258_v60, %v238_v57  ;;  %v355_v57 = vsub.s32 6, %v1015_v59 }
 0x1a6   :  { %v284_v16 = vrot.slane %v260_v1, %v1021_v0 }
 0x1a7   :  { %v235_v61 = vpop.xlane.xlu0 %234  ;;  %v244_v62 = vpop.xlane.xlu1 %243 }
 0x1a8   :  { %v259_v63 = vadd.f32 %v258_v60, %v235_v61  ;;  %v1024_v3 = vadd.f32 %v258_v60, %v244_v62  ;;  %v359_v62 = vsub.s32 7, %v1015_v59 }
 0x1aa   :  { %v280_v2 = vrot.slane %v259_v63, %v1021_v0  ;;  %v292_v20 = vrot.slane %v1024_v3, %v1021_v0 }
 0x1ab   :  { %v241_v4 = vpop.xlane.xlu1 %240  ;;  %v247_v6 = vpop.xlane.xlu0 %246 }
 0x1ac   :  { %v261_v14 = vadd.f32 %v258_v60, %v241_v4  ;;  %v1026_v15 = vadd.f32 %v258_v60, %v247_v6  ;;  %v310_v19 = vsel %vm309_vm1, %v284_v16, %v280_v2 }
 0x1ae   :  { %v288_v17 = vrot.slane %v261_v14, %v1021_v0  ;;  %v296_v18 = vrot.slane %v1026_v15, %v1021_v0 }
 0x1af   :  { %v250_v21 = vpop.xlane.xlu1 %249  ;;  %v253_v22 = vpop.xlane.xlu0 %252 }
 0x1b0   :  { %v312_v23 = vsel %vm311_vm2, %v288_v17, %v310_v19  ;;  %v264_v24 = vadd.f32 %v258_v60, %v250_v21  ;;  %v1036_v25 = vadd.f32 %v258_v60, %v253_v22 }
 0x1b1   :  { %v314_v26 = vsel %vm313_vm3, %v292_v20, %v312_v23 }
 0x1b2   :  { %v316_v27 = vsel %vm315_vm4, %v296_v18, %v314_v26  ;;  %v300_v28 = vrot.slane %v264_v24, %v1021_v0  ;;  %v304_v29 = vrot.slane %v1036_v25, %v1021_v0 }
 0x1b3   :  { %v256_v30 = vpop.xlane.xlu1 %255 }
 0x1b4   :  { %v266_v31 = vadd.f32 %v258_v60, %v256_v30  ;;  %v318_v32 = vsel %vm317_vm5, %v300_v28, %v316_v27 }
 0x1b5   :  { %v320_v34 = vsel %vm319_vm6, %v304_v29, %v318_v32 }
 0x1b6   :  { %v308_v33 = vrot.slane %v266_v31, %v1021_v0 }
 0x1b8   :  { %v322_v35 = vsel %vm321_vm7, %v308_v33, %v320_v34 }
 0x1b9   :  { %v325_v36 = vsel %vm324_vm8, %v322_v35, -inf }
 0x1ba   :  { %326 = vmax.xlane.f32.xlu0 %v325_v36 }
 0x247   :  { %v327_v42 = vpop.xlane.xlu0 %326 }
 0x248   :  { %v332_v43 = vrot.slane %v327_v42, %v331_v38  ;;  %v336_v44 = vrot.slane %v327_v42, %v335_v39  ;;  %v340_v45 = vrot.slane %v327_v42, %v339_v40  ;;  %v344_v47 = vrot.slane %v327_v42, %v343_v41 }
 0x249   :  { %v348_v54 = vrot.slane %v327_v42, %v347_v46  ;;  %v352_v58 = vrot.slane %v327_v42, %v351_v53  ;;  %v360_v6 = vrot.slane %v327_v42, %v359_v62 }
 0x24a   :  { %v369_v48 = vsub.f32 %v259_v63, %v332_v43  ;;  %v370_v49 = vsub.f32 %v260_v1, %v336_v44  ;;  %v371_v50 = vsub.f32 %v261_v14, %v340_v45  ;;  %v372_v55 = vsub.f32 %v1024_v3, %v344_v47 }
 0x24b   :  { %v373_v60 = vsub.f32 %v1026_v15, %v348_v54  ;;  %v356_v63 = vrot.slane %v327_v42, %v355_v57  ;;  %v374_v1 = vsub.f32 %v264_v24, %v352_v58  ;;  %v376_v17 = vsub.f32 %v266_v31, %v360_v6 }
 0x24c   :  { %v377_v51 = vmul.f32 1.442695, %v369_v48  ;;  %v379_v52 = vmul.f32 1.442695, %v370_v49  ;;  %v381_v56 = vmul.f32 1.442695, %v371_v50 }
 0x24d   :  { %v383_v61 = vmul.f32 1.442695, %v372_v55  ;;  %v385_v2 = vmul.f32 1.442695, %v373_v60  ;;  %v375_v14 = vsub.f32 %v1036_v25, %v356_v63  ;;  %v387_v15 = vmul.f32 1.442695, %v374_v1 }
 0x24e   :  { %789 = vpow2.f32 %v377_v51  ;;  %v391_v20 = vmul.f32 1.442695, %v376_v17 }
 0x24f   :  { %791 = vpow2.f32 %v379_v52  ;;  %v389_v18 = vmul.f32 1.442695, %v375_v14 }
 0x250   :  { %793 = vpow2.f32 %v381_v56 }
 0x251   :  { %795 = vpow2.f32 %v383_v61 }
 0x252   :  { %797 = vpow2.f32 %v385_v2 }
 0x253   :  { %799 = vpow2.f32 %v387_v15 }
 0x254   :  { %801 = vpow2.f32 %v389_v18 }
 0x255   :  { %803 = vpow2.f32 %v391_v20 }
 0x258   :  { %v790_v3 = vpop.eup %789 }
 0x259   :  { %v792_v4 = vpop.eup %791  ;;  %402 = vperm.xlu1 %771, %v790_v3  }
 0x25a   :  { %405 = vperm.xlu0 %772, %v792_v4   ;;  %v794_v16 = vpop.eup %793 }
 0x25b   :  { %v796_v19 = vpop.eup %795 }
 0x25c   :  { %v798_v21 = vpop.eup %797 }
 0x25d   :  { %408 = vperm.xlu1 %771, %v794_v16   ;;  %v800_v22 = vpop.eup %799 }
 0x25e   :  { %v802_v23 = vpop.eup %801 }
 0x25f   :  { %v804_v24 = vpop.eup %803 }
 0x261   :  { %411 = vperm.xlu1 %771, %v796_v19  }
 0x265   :  { %414 = vperm.xlu1 %771, %v798_v21  }
 0x269   :  { %417 = vperm.xlu1 %771, %v800_v22  }
 0x26d   :  { %420 = vperm.xlu1 %771, %v802_v23  }
 0x271   :  { %423 = vperm.xlu1 %771, %v804_v24  }
 0x2d8   :  { %v403_v25 = vpop.permute.xlu1 %402 }
 0x2d9   :  { %v406_v29 = vpop.permute.xlu0 %405  ;;  %v428_v32 = vrot.slane %v403_v25, %v1021_v0 }
 0x2da   :  { %v432_v31 = vrot.slane %v406_v29, %v1021_v0 }
 0x2dc   :  { %v409_v26 = vpop.permute.xlu1 %408  ;;  %v457_v37 = vsel %vm309_vm1, %v432_v31, %v428_v32 }
 0x2dd   :  { %v436_v33 = vrot.slane %v409_v26, %v1021_v0 }
 0x2df   :  { %v458_v43 = vsel %vm311_vm2, %v436_v33, %v457_v37 }
 0x2e0   :  { %v412_v27 = vpop.permute.xlu1 %411 }
 0x2e1   :  { %v440_v34 = vrot.slane %v412_v27, %v1021_v0 }
 0x2e3   :  { %v459_v45 = vsel %vm313_vm3, %v440_v34, %v458_v43 }
 0x2e4   :  { %v415_v28 = vpop.permute.xlu1 %414 }
 0x2e5   :  { %v444_v35 = vrot.slane %v415_v28, %v1021_v0 }
 0x2e7   :  { %v460_v47 = vsel %vm315_vm4, %v444_v35, %v459_v45 }
 0x2e8   :  { %v418_v30 = vpop.permute.xlu1 %417 }
 0x2e9   :  { %v448_v42 = vrot.slane %v418_v30, %v1021_v0 }
 0x2eb   :  { %v461_v49 = vsel %vm317_vm5, %v448_v42, %v460_v47 }
 0x2ec   :  { %v421_v36 = vpop.permute.xlu1 %420 }
 0x2ed   :  { %v452_v44 = vrot.slane %v421_v36, %v1021_v0 }
 0x2ef   :  { %v462_v51 = vsel %vm319_vm6, %v452_v44, %v461_v49 }
 0x2f0   :  { %v424_v48 = vpop.permute.xlu1 %423 }
 0x2f1   :  { %v456_v50 = vrot.slane %v424_v48, %v1021_v0 }
 0x2f3   :  { %v463_v52 = vsel %vm321_vm7, %v456_v50, %v462_v51 }
 0x2f4   :  { %v465_v54 = vsel %vm324_vm8, %v463_v52, 0.0 }
 0x2f5   :  { %466 = vadd.xlane.f32.xlu1 %v465_v54 }
 0x382   :  { %v467_v55 = vpop.xlane.xlu1 %466 }
 0x383   :  { %805 = vrcp.f32 %v467_v55 }
 0x38d   :  { %v806_v56 = vpop.eup %805 }
 0x38e   :  { %v473_v58 = vrot.slane %v806_v56, %v331_v38  ;;  %v477_v61 = vrot.slane %v806_v56, %v335_v39  ;;  %v481_v1 = vrot.slane %v806_v56, %v339_v40  ;;  %v485_v6 = vrot.slane %v806_v56, %v343_v41 }
 0x38f   :  { %v489_v15 = vrot.slane %v806_v56, %v347_v46  ;;  %v493_v39 = vrot.slane %v806_v56, %v351_v53  ;;  %v497_v40 = vrot.slane %v806_v56, %v355_v57  ;;  %v501_v41 = vrot.slane %v806_v56, %v359_v62 }
 0x390   :  { %v510_v60 = vmul.f32 %v790_v3, %v473_v58  ;;  %v511_v63 = vmul.f32 %v792_v4, %v477_v61  ;;  %v512_v2 = vmul.f32 %v794_v16, %v481_v1  ;;  %v513_v14 = vmul.f32 %v796_v19, %v485_v6 }
 0x391   :  { %v514_v38 = vmul.f32 %v798_v21, %v489_v15  ;;  %v515_v3 = vmul.f32 %v800_v22, %v493_v39  ;;  %v516_v4 = vmul.f32 %v802_v23, %v497_v40  ;;  %v517_v16 = vmul.f32 %v804_v24, %v501_v41 }
 0x392   :  { %520 = vperm.xlu0 %772, %v510_v60  }
 0x396   :  { %525 = vperm.xlu0 %772, %v511_v63  }
 0x39a   :  { %530 = vperm.xlu0 %772, %v512_v2  }
 0x39e   :  { %535 = vperm.xlu0 %772, %v513_v14  }
 0x3a2   :  { %540 = vperm.xlu0 %772, %v514_v38  }
 0x3a6   :  { %545 = vperm.xlu0 %772, %v515_v3  }
 0x3aa   :  { %550 = vperm.xlu0 %772, %v516_v4  }
 0x3ae   :  { %555 = vperm.xlu0 %772, %v517_v16  }
 0x411   :  { %v521_v17 = vpop.permute.xlu0 %520 }
 0x412   :  { %v558_v19 = vmul.f32 %v521_v17, %v969_v5  ;;  %v625_v35 = vrot.slane %v521_v17, %v1021_v0 }
 0x414   :  { %v566_v57 = vsel %vm65_vm0, %v558_v19, 0.0 }
 0x415   :  { %v526_v46 = vpop.permute.xlu0 %525  ;;  %v567_v24 = vrot.slane %v566_v57, 4 }
 0x416   :  { %v559_v18 = vmul.f32 %v526_v46, %v977_v8  ;;  %v629_v34 = vrot.slane %v526_v46, %v1021_v0 }
 0x418   :  { %v573_v21 = vsel %vm65_vm0, %v559_v18, 0.0  ;;  %v654_v51 = vsel %vm309_vm1, %v629_v34, %v625_v35 }
 0x419   :  { %v531_v53 = vpop.permute.xlu0 %530  ;;  %v574_v23 = vrot.slane %v573_v21, 4 }
 0x41a   :  { %v560_v20 = vmul.f32 %v531_v53, %v981_v10  ;;  %v568_v10 = vadd.f32 %v567_v24, %v566_v57  ;;  %v633_v37 = vrot.slane %v531_v53, %v1021_v0 }
 0x41b   :  { %v575_v28 = vadd.f32 %v574_v23, %v573_v21 }
 0x41c   :  { %v580_v22 = vsel %vm65_vm0, %v560_v20, 0.0  ;;  %v569_v43 = vrot.slane %v568_v10, 2  ;;  %v655_v56 = vsel %vm311_vm2, %v633_v37, %v654_v51 }
 0x41d   :  { %v536_v59 = vpop.permute.xlu0 %535  ;;  %v581_v25 = vrot.slane %v580_v22, 4  ;;  %v576_v36 = vrot.slane %v575_v28, 2 }
 0x41e   :  { %v561_v62 = vmul.f32 %v536_v59, %v991_v12  ;;  %v637_v44 = vrot.slane %v536_v59, %v1021_v0  ;;  %v570_v61 = vadd.f32 %v569_v43, %v568_v10 }
 0x41f   :  { %v582_v29 = vadd.f32 %v581_v25, %v580_v22  ;;  %v577_v55 = vadd.f32 %v576_v36, %v575_v28 }
 0x420   :  { %v587_v26 = vsel %vm65_vm0, %v561_v62, 0.0  ;;  %v656_v1 = vsel %vm313_vm3, %v637_v44, %v655_v56  ;;  %v571_v20 = vrot.slane %v570_v61, 1 }
 0x421   :  { %v588_v8 = vrot.slane %v587_v26, 4  ;;  %v541_v27 = vpop.permute.xlu0 %540  ;;  %v578_v41 = vrot.slane %v577_v55, 1 }
 0x422   :  { %v562_v5 = vmul.f32 %v541_v27, %v973_v7  ;;  %v583_v7 = vrot.slane %v582_v29, 2  ;;  %v641_v48 = vrot.slane %v541_v27, %v1021_v0 }
 0x423   :  { %v589_v31 = vadd.f32 %v588_v8, %v587_v26 }
 0x424   :  { %v594_v30 = vsel %vm65_vm0, %v562_v5, 0.0  ;;  %v584_v63 = vadd.f32 %v583_v7, %v582_v29  ;;  %v657_v14 = vsel %vm315_vm4, %v641_v48, %v656_v1 }
 0x425   :  { %v595_v32 = vrot.slane %v594_v30, 4  ;;  %v546_v33 = vpop.permute.xlu0 %545  ;;  %v590_v47 = vrot.slane %v589_v31, 2 }
 0x426   :  { %v563_v12 = vmul.f32 %v546_v33, %v979_v9  ;;  %v645_v52 = vrot.slane %v546_v33, %v1021_v0  ;;  %v585_v18 = vrot.slane %v584_v63, 1 }
 0x427   :  { %v596_v42 = vadd.f32 %v595_v32, %v594_v30  ;;  %v591_v6 = vadd.f32 %v590_v47, %v589_v31 }
 0x428   :  { %v601_v45 = vsel %vm65_vm0, %v563_v12, 0.0  ;;  %v658_v3 = vsel %vm317_vm5, %v645_v52, %v657_v14 }
 0x429   :  { %v602_v49 = vrot.slane %v601_v45, 4  ;;  %v551_v50 = vpop.permute.xlu0 %550  ;;  %v597_v9 = vrot.slane %v596_v42, 2  ;;  %v592_v21 = vrot.slane %v591_v6, 1 }
 0x42a   :  { %v564_v54 = vmul.f32 %v551_v50, %v983_v11  ;;  %v649_v60 = vrot.slane %v551_v50, %v1021_v0 }
 0x42b   :  { %v603_v58 = vadd.f32 %v602_v49, %v601_v45  ;;  %v598_v39 = vadd.f32 %v597_v9, %v596_v42 }
 0x42c   :  { %v608_v2 = vsel %vm65_vm0, %v564_v54, 0.0  ;;  %v659_v46 = vsel %vm319_vm6, %v649_v60, %v658_v3 }
 0x42d   :  { %v604_v15 = vrot.slane %v603_v58, 2  ;;  %v609_v38 = vrot.slane %v608_v2, 4  ;;  %v556_v11 = vpop.permute.xlu0 %555 }
 0x42e   :  { %v565_v40 = vmul.f32 %v556_v11, %v995_v13  ;;  %v653_v4 = vrot.slane %v556_v11, %v1021_v0  ;;  %v599_v13 = vrot.slane %v598_v39, 1 }
 0x42f   :  { %v605_v16 = vadd.f32 %v604_v15, %v603_v58  ;;  %v610_v17 = vadd.f32 %v609_v38, %v608_v2 }
 0x430   :  { %v615_v19 = vsel %vm65_vm0, %v565_v40, 0.0  ;;  %v660_v53 = vsel %vm321_vm7, %v653_v4, %v659_v46 }
 0x431   :  { %v611_v57 = vrot.slane %v610_v17, 2  ;;  %v616_v22 = vrot.slane %v615_v19, 4  ;;  %662 = vst.msk [vmem:[#allocation9] sm:$0xff] %vm324_vm8, %v660_v53 }
 0x432   :  { %862 = shalt.err (!%p859_p6)
}
 0x433   :  { %s863_s29 = scalar_lea.hbm %s1177_s6, 128 }
 0x434   :  { %p864_p7 = scmp.ne.s32.totalorder %s1177_s6, %s863_s29  ;;  %p867_p8 = scmp.lt.u32.totalorder %s863_s29, %s1177_s6 }
 0x436   :  { %p869_p9 = pnand %p867_p8, %p864_p7 }
 0x438   :  { %872 = shalt.err (!%p869_p9)
}
 0x439   :  { %699 = dma.vmem_to_hbm [thread:$0]  %s697_s25, 128, %s1177_s6, [#allocation10]   ;;  %v579_v0 = vadd.f32 %v578_v41, %v577_v55  ;;  %v606_v59 = vrot.slane %v605_v16, 1  ;;  %v612_v62 = vadd.f32 %v611_v57, %v610_v17  ;;  %v617_v23 = vadd.f32 %v616_v22, %v615_v19 }
 0x43a   :  { %v586_v24 = vadd.f32 %v585_v18, %v584_v63  ;;  %v572_v25 = vadd.f32 %v571_v20, %v570_v61  ;;  %v593_v26 = vadd.f32 %v592_v21, %v591_v6  ;;  %v600_v5 = vadd.f32 %v599_v13, %v598_v39  ;;  %s909_s6 = smov [#allocation8]  }
 0x43b   :  { %v613_v8 = vrot.slane %v612_v62, 1  ;;  %v618_v27 = vrot.slane %v617_v23, 2  ;;  %v607_v10 = vadd.f32 %v606_v59, %v605_v16  ;;  %s686_s12 = sshll.u32 %s909_s6, 4  ;;  %s687_s12 = int_to_ptr.vmem [resolvable:$true] %s686_s12 }
 0x43c   :  { %v671_v28 = vsel %vm309_vm1, %v579_v0, %v572_v25  ;;  %s873_s13 = scalar_lea.vmem %s687_s12, 128  ;;  %p878_p11 = scmp.lt.s32.totalorder %s687_s12, %s687_s12 }
 0x43d   :  { %v619_v29 = vadd.f32 %v618_v27, %v617_v23  ;;  %v672_v30 = vsel %vm311_vm2, %v586_v24, %v671_v28  ;;  %v614_v31 = vadd.f32 %v613_v8, %v612_v62  ;;  %p874_p10 = scmp.ne.s32.totalorder %s687_s12, %s873_s13  ;;  %p879_p12 = scmp.lt.s32.totalorder %s873_s13, %s873_s13 }
 0x43e   :  { %v673_v33 = vsel %vm313_vm3, %v593_v26, %v672_v30 }
 0x43f   :  { %v620_v32 = vrot.slane %v619_v29, 1  ;;  %v674_v34 = vsel %vm315_vm4, %v600_v5, %v673_v33  ;;  %p880_p13 = por %p879_p12, %p878_p11 }
 0x440   :  { %v675_v35 = vsel %vm317_vm5, %v607_v10, %v674_v34 }
 0x441   :  { %v621_v12 = vadd.f32 %v620_v32, %v619_v29  ;;  %v676_v36 = vsel %vm319_vm6, %v614_v31, %v675_v35  ;;  %p881_p0 = pnand %p880_p13, %p874_p10 }
 0x443   :  { %v677_v37 = vsel %vm321_vm7, %v621_v12, %v676_v36 }
 0x444   :  { %679 = vst.msk [vmem:[#allocation8] sm:$0xff] %vm65_vm0, %v677_v37 }
 0x445   :  { %884 = shalt.err (!%p881_p0)
}
 0x446   :  { %s885_s16 = scalar_lea.hbm %s1176_s5, 128 }
 0x447   :  { %p886_p1 = scmp.ne.s32.totalorder %s1176_s5, %s885_s16  ;;  %p889_p2 = scmp.lt.u32.totalorder %s885_s16, %s1176_s5 }
 0x449   :  { %p891_p3 = pnand %p889_p2, %p886_p1 }
 0x44b   :  { %894 = shalt.err (!%p891_p3)
}
 0x44c   :  { %689 = dma.vmem_to_hbm [thread:$0]  %s687_s12, 128, %s1176_s5, [#allocation5]  }
 0x44d   :  { %899 = dma.done.wait [#allocation5], 128  }
 0x44e   :  { %900 = vsyncadd [#allocation5], 4294967168 }
 0x44f   :  { %901 = dma.done.wait [#allocation10], 128  }
 0x450   :  { %902 = vsyncadd [#allocation10], 4294967168 }
 0x451   :  { %706 = vsyncpa [#allocation4], 1 }
 0x452   :  { %707 = vsyncpa [#allocation7], 1 }
 0x453   :  { %708 = vsyncpa [#allocation5], 1 }
 0x454   :  { %709 = vsyncpa [#allocation10], 1 }

</bundles_post_ra>
